<compile_context>
chip_gen: v5e
topology: v5e:2x2
jax: 0.10.0
libtpu: 0.0.40
codegen_flags: <defaults>
</compile_context>

<pallas_src>
import jax
import jax.numpy as jnp
from jax.experimental import pallas as pl
from jax.experimental.pallas import tpu as pltpu


_LANE = 128
_TILE_BYTES_TARGET = 4 * 1024 * 1024      # ~4 MiB per pipelined tile buffer
_VMEM_LIMIT_BYTES = 48 * 1024 * 1024      # <= 48 MiB: safe on v7x (64 MiB VMEM)


def _sublane_pack(dtype):
    itemsize = jnp.dtype(dtype).itemsize
    return max(8, 32 // itemsize)          # 8 f32, 16 bf16/fp16, 32 int8/fp8


def _round_up(x, m):
    return ((x + m - 1) // m) * m


# ---------------------------------------------------------------------------
# Kernels
# ---------------------------------------------------------------------------

def _droppath_rows_kernel(scale_ref, x_ref, o_ref):
    # scale_ref: (B,) f32 in SMEM.  x_ref / o_ref: (tile_r, C) VMEM tile of
    # sample b = program_id(0).
    s = scale_ref[pl.program_id(0)]
    o_ref[...] = (x_ref[...].astype(jnp.float32) * s).astype(o_ref.dtype)


def _droppath_lanes_kernel(scale_ref, x_ref, o_ref):
    # scale_ref: (B, 1) f32 VMEM block (broadcast over lanes).
    # x_ref / o_ref: (B, tile_n) VMEM tile of the flattened input / output.
    o_ref[...] = (x_ref[...].astype(jnp.float32) * scale_ref[...]).astype(o_ref.dtype)


# ---------------------------------------------------------------------------
# Tile-size selection (byte-targeted, sublane-padding aware)
# ---------------------------------------------------------------------------

def _pick_cols(n):
    """Largest multiple-of-128 divisor of n (capped at 2048) that still
    leaves at least 8 rows per sample, so row tiles can be full sublanes."""
    best = _LANE
    limit = min(max(n // 8, _LANE), 16 * _LANE)
    c = _LANE
    while c <= limit:
        if n % c == 0:
            best = c
        c += _LANE
    return best


def _pick_tile_rows(rows, cols, itemsize, pack):
    """Row-tile targeting ~_TILE_BYTES_TARGET per buffer, a multiple of the
    dtype sublane pack (or the full extent, which always divides exactly)."""
    rows_budget = max(_TILE_BYTES_TARGET // (cols * itemsize), pack)
    if rows <= rows_budget:
        return rows
    return max((rows_budget // pack) * pack, pack)


def _pick_tile_cols(batch, n, itemsize, pack):
    """Fallback layout: lane-axis tile sized by bytes, accounting for the
    sublane padding of the (batch, tile_n) block."""
    padded_rows = _round_up(batch, pack)
    cols_budget = max(_TILE_BYTES_TARGET // (padded_rows * itemsize), _LANE)
    tile_n = (cols_budget // _LANE) * _LANE
    if n <= tile_n:
        return n
    return tile_n


# ---------------------------------------------------------------------------
# Wrapper
# ---------------------------------------------------------------------------

def drop_path(x, drop_prob, seed, training=True, donate=False):
    """DropPath forward. x: any-rank array with leading batch dim."""
    drop_prob = float(drop_prob)
    if drop_prob <= 0.0 or not training:
        return x

    keep_prob = 1.0 - drop_prob
    batch = x.shape[0]
    n = 1
    for d in x.shape[1:]:
        n *= d
    if batch == 0 or n == 0:
        return x

    # Per-sample keep mask / scale, hoisted out of the tiled hot path.
    # Kept in f32 so 1/keep_prob is not quantized for low-precision inputs.
    key = jax.random.PRNGKey(int(seed))
    u = jax.random.uniform(key, (batch,), dtype=jnp.float32)
    scale = jnp.where(u < keep_prob, jnp.float32(1.0 / keep_prob), jnp.float32(0.0))

    itemsize = jnp.dtype(x.dtype).itemsize
    pack = _sublane_pack(x.dtype)
    io_aliases = {1: 0} if donate else {}

    if n % _LANE == 0:
        # Main path: per-sample 2-D layout with full-sublane, lane-dense tiles.
        cols = _pick_cols(n)
        rows = n // cols
        tile_r = _pick_tile_rows(rows, cols, itemsize, pack)
        x3d = x.reshape(batch, rows, cols)
        grid = (batch, pl.cdiv(rows, tile_r))

        out3d = pl.pallas_call(
            _droppath_rows_kernel,
            out_shape=jax.ShapeDtypeStruct((batch, rows, cols), x.dtype),
            grid=grid,
            in_specs=[
                pl.BlockSpec(memory_space=pltpu.MemorySpace.SMEM),         # scale (B,)
                pl.BlockSpec((None, tile_r, cols), lambda b, r: (b, r, 0)),
            ],
            out_specs=pl.BlockSpec((None, tile_r, cols), lambda b, r: (b, r, 0)),
            compiler_params=pltpu.CompilerParams(
                dimension_semantics=("parallel", "parallel"),
                vmem_limit_bytes=_VMEM_LIMIT_BYTES,
            ),
            input_output_aliases=io_aliases,
        )(scale, x3d)
        return out3d.reshape(x.shape)

    # Fallback path: trailing size not a multiple of 128.
    tile_n = _pick_tile_cols(batch, n, itemsize, pack)
    x2d = x.reshape(batch, n)
    scale2d = scale.reshape(batch, 1)
    grid = (pl.cdiv(n, tile_n),)

    out2d = pl.pallas_call(
        _droppath_lanes_kernel,
        out_shape=jax.ShapeDtypeStruct((batch, n), x.dtype),
        grid=grid,
        in_specs=[
            pl.BlockSpec((batch, 1), lambda j: (0, 0)),        # scale (tiny, reused)
            pl.BlockSpec((batch, tile_n), lambda j: (0, j)),   # x tile
        ],
        out_specs=pl.BlockSpec((batch, tile_n), lambda j: (0, j)),
        compiler_params=pltpu.CompilerParams(
            dimension_semantics=("parallel",),
            vmem_limit_bytes=_VMEM_LIMIT_BYTES,
        ),
        input_output_aliases=io_aliases,
    )(scale2d, x2d)
    return out2d.reshape(x.shape)


if __name__ == "__main__":
    key = jax.random.PRNGKey(0)
    # NCHW-like input: batch=2, channels=4, spatial=16x16.
    x = jax.random.normal(key, (2, 4, 16, 16), dtype=jnp.float32)

    drop_prob = 0.5
    keep_prob = 1.0 - drop_prob

    # Main (lane-aligned) path.
    out = jax.block_until_ready(drop_path(x, drop_prob, seed=1234, training=True))
    for b in range(x.shape[0]):
        ob, xb = out[b], x[b]
        zero = bool(jnp.all(ob == 0.0))
        scaled = bool(jnp.allclose(ob, xb / keep_prob, atol=1e-5, rtol=1e-5))
        assert zero or scaled, f"sample {b}: not a valid DropPath output"

    # Fallback (non-128-multiple trailing size) path.
    x_odd = jax.random.normal(jax.random.PRNGKey(1), (2, 3, 5, 7), dtype=jnp.float32)
    out_odd = jax.block_until_ready(drop_path(x_odd, drop_prob, seed=7, training=True))
    for b in range(x_odd.shape[0]):
        ob, xb = out_odd[b], x_odd[b]
        zero = bool(jnp.all(ob == 0.0))
        scaled = bool(jnp.allclose(ob, xb / keep_prob, atol=1e-5, rtol=1e-5))
        assert zero or scaled, f"odd sample {b}: not a valid DropPath output"

    # Eval mode is the identity.
    out_eval = jax.block_until_ready(drop_path(x, drop_prob, seed=1234, training=False))
    assert bool(jnp.allclose(out_eval, x))

    print("KERNEL_OK")
</pallas_src>

<mosaic_0001>
module attributes {stable_mosaic.version = 11 : i64} {
  func.func @_droppath_rows_kernel(%arg0: i32, %arg1: i32, %arg2: memref<2xf32, #tpu.memory_space<smem>>, %arg3: memref<1x8x128xf32, #tpu.memory_space<vmem>>, %arg4: memref<1x8x128xf32, #tpu.memory_space<vmem>>) attributes {dimension_semantics = [#tpu.dimension_semantics<parallel>, #tpu.dimension_semantics<parallel>], iteration_bounds = array<i64: 2, 1>, scalar_prefetch = 0 : i64, scratch_operands = 0 : i64, tpu.core_type = #tpu.core_type<tc>, window_params = [{transform_indices = @transform_0, window_bounds = array<i64: 2>}, {transform_indices = @transform_1, window_bounds = array<i64: 1, 8, 128>}, {transform_indices = @transform_2, window_bounds = array<i64: 1, 8, 128>}]} {
    %0 = arith.index_cast %arg0 : i32 to index
    %1 = memref.load %arg2[%0] : memref<2xf32, #tpu.memory_space<smem>>
    %c0 = arith.constant 0 : index
    %c0_0 = arith.constant 0 : index
    %c0_1 = arith.constant 0 : index
    %2 = vector.load %arg3[%c0, %c0_0, %c0_1] : memref<1x8x128xf32, #tpu.memory_space<vmem>>, vector<1x8x128xf32>
    %3 = vector.shape_cast %2 : vector<1x8x128xf32> to vector<8x128xf32>
    %4 = vector.broadcast %1 : f32 to vector<8x128xf32>
    %5 = arith.mulf %3, %4 : vector<8x128xf32>
    %c0_2 = arith.constant 0 : index
    %c0_3 = arith.constant 0 : index
    %c0_4 = arith.constant 0 : index
    %6 = vector.load %arg4[%c0_2, %c0_3, %c0_4] : memref<1x8x128xf32, #tpu.memory_space<vmem>>, vector<1x8x128xf32>
    %7 = vector.shape_cast %6 : vector<1x8x128xf32> to vector<8x128xf32>
    %8 = vector.shape_cast %5 : vector<8x128xf32> to vector<1x8x128xf32>
    tpu.vector_store %arg4[%c0_2, %c0_3, %c0_4], %8 {strides = array<i32>} : memref<1x8x128xf32, #tpu.memory_space<vmem>>, vector<1x8x128xf32>,
    return
  }
  func.func @transform_0(%arg0: i32, %arg1: i32) -> i32 {
    %c0_i32 = arith.constant 0 : i32
    %c0_i32_0 = arith.constant 0 : i32
    return %c0_i32 : i32
  }
  func.func @transform_1(%arg0: i32, %arg1: i32) -> (i32, i32, i32) {
    %c0_i32 = arith.constant 0 : i32
    %c0_i32_0 = arith.constant 0 : i32
    return %arg0, %arg1, %c0_i32 : i32, i32, i32
  }
  func.func @transform_2(%arg0: i32, %arg1: i32) -> (i32, i32, i32) {
    %c0_i32 = arith.constant 0 : i32
    %c0_i32_0 = arith.constant 0 : i32
    return %arg0, %arg1, %c0_i32 : i32, i32, i32
  }
}

</mosaic_0001>

<bundles_post_ra>
// kernel: tpu_custom_call.1
= control target key start
LH: loop header
LB: loop body
LE: loop exit
PB: predicated region body
PF: predicated region fallthrough
CT: control target
= control target key end

     0   :  { %7 = vsyncpa [#allocation5], 0  ;;  %s689_s0 = inlined_call_operand.hbm [shape: f32[2], index: 0, kind: input, shape index: {}]   ;;  %s690_s1 = inlined_call_operand.hbm [shape: f32[2,8,128], index: 1, kind: input, shape index: {}]   ;;  %s691_s2 = inlined_call_operand.hbm [shape: f32[2,8,128], index: 2, kind: output, shape index: {}]  }
   0x1   :  { %8 = vsyncpa [#allocation3], 0 }
   0x2   :  { %10 = vsyncpa [#allocation3 + $0x1], 0 }
   0x3   :  { %11 = vsyncpa [#allocation4], 0 }
   0x4   :  { %13 = vsyncpa [#allocation4 + $0x1], 0  ;;  %s543_s9 = smov 0   ;;  %s545_s10 = smov 0  }
   0x5   :  { %s547_s11 = smov 0   ;;  %s549_s12 = smov 0  }
   0x6   :  { %s551_s13 = smov 0   ;;  %s553_s14 = smov 0  }
   0x7 LB: > { %s306_s15 = sadd.s32 4294967295, %s525_s14   ;;  %s307_s16 = sadd.s32 4294967294, %s525_s14   ;;  %s525_s14 = sphi %s553_s14, %s19_s14   ;;  %s521_s13 = sphi %s551_s13, %s703_s13   ;;  %s517_s12 = sphi %s549_s12, %s702_s12   ;;  %s513_s11 = sphi %s547_s11, %s701_s11   ;;  %s509_s10 = sphi %s545_s10, %s700_s10   ;;  %s505_s9 = sphi %s543_s9, %s699_s9  }
   0x8   : > { %p74_p0 = scmp.ne.s32.totalorder %s509_s10, %s505_s9  ;;  %p577_p1 = scmp.eq.s32.totalorder %s306_s15, 0 }
   0x9   : > { %p581_p2 = scmp.eq.s32.totalorder %s306_s15, 1  ;;  %p106_p3 = scmp.eq.s32.totalorder %s307_s16, 1 }
   0xa   : > { %p587_p4 = por %p577_p1, %p74_p0  ;;  %p308_p5 = scmp.ge.s32.totalorder %s525_s14, 1 }
   0xb   : > { %p592_p6 = por %p106_p3, %p74_p0  ;;  %p113_p7 = scmp.lt.s32.totalorder %s525_s14, 3 }
   0xc   : > { %s125_s23 = sshll.u32 %s689_s0, 4  ;;  %s31_s25 = sadd.s32 1, %s521_s13  ;;  %s126_s23 = int_to_ptr.hbm [resolvable:$true] %s125_s23 }
   0xd   : > { %p600_p8 = pnand %p308_p5, %p113_p7  ;;  %s61_s26 = sadd.s32 1, %s513_s11 }
   0xe   : > { %p33_p12 = scmp.ge.s32.totalorder %s31_s25, 2  ;;  %s527_s27 = smov [#allocation2]  }
   0xf   : > { %p329_p10 = pneg %p600_p8  ;;  %p68_p13 = scmp.ne.s32.totalorder %s513_s11, %s509_s10 }
  0x10   : > { %s705_s25 = smov (%p33_p12, %s31_s25), 0  ;;  %p69_p0 = scmp.eq.s32.totalorder %s525_s14, 0 }
  0x11   : > { %p330_p11 = pnand %p329_p10, %p577_p1  ;;  %s56_s28 = ssub.s32 %s521_s13, %s705_s25 }
  0x12   : > { %p342_p3 = scmp.lt.s32.totalorder %s525_s14, 2  ;;  %p59_p5 = scmp.eq.s32.totalorder %s56_s28, 0 }
  0x13   : > { %332 = dma.hbm_to_smem (!%p330_p11), %s126_s23, 16, %s527_s27, [#allocation5]  }
  0x14   : > { %p70_p7 = por %p69_p0, %p68_p13  ;;  %p621_p9 = por %p581_p2, %p68_p13 }
  0x15   : > { %s136_s30 = sand.u32 1, %s513_s11   ;;  %s312_s5 = sshll.u32 %s521_s13, 3 }
  0x16   : > { %s627_s3 = scalar_select %p59_p5, %s513_s11, %s61_s26  }
  0x17   : > { %s311_s4 = sshll.u32 %s136_s30, 3  ;;  %s145_s8 = scalar_lea.hbm %s690_s1, %s312_s5 }
  0x18   : > { %s140_s15 = scalar_lea.vmem [#allocation6], %s311_s4  ;;  %s147_s21 = sshll.u32 %s145_s8, 4  ;;  %s148_s21 = int_to_ptr.hbm [resolvable:$true] %s147_s21 }
  0x19   : > { %s149_s16 = sshll.u32 %s140_s15, 4  ;;  %p334_p10 = pnand %p342_p3, %p70_p7  ;;  %s150_s16 = int_to_ptr.vmem [resolvable:$true] %s149_s16 }
  0x1a   : > { %s137_s18 = scalar_lea.sflag [#allocation3], %s136_s30  ;;  %158 = sbr.rel (%p600_p8) target bundleno = 53 (0x35), region = 28 }
  0x1b   : > { %336 = dma.hbm_to_vmem [thread:$0]  (!%p334_p10), %s148_s21, 128, %s150_s16, %s137_s18  }
  0x1f   : > { %492 = dma.done.wait (%p577_p1), [#allocation5], 16  }
  0x20   : > { %494 = vsyncadd (%p577_p1), [#allocation5], 4294967280  ;;  %s642_s22 = sand.u32 1, %s509_s10  }
  0x21   : > { %s315_s23 = sshll.u32 %s642_s22, 3  ;;  %s166_s26 = scalar_lea.sflag [#allocation3], %s642_s22 }
  0x22   : > { %s169_s27 = scalar_lea.vmem [#allocation6], %s315_s23 }
  0x23   : > { %496 = dma.done.wait (%p587_p4), %s166_s26, 128  }
  0x24   : > { %498 = vsyncadd (%p587_p4), %s166_s26, 4294967168 }
  0x25   : > { %175 = sfence }
  0x26   : > { %s192_s17 = sld [smem:[#allocation2 + %s517_s12]]  ;;  %s318_s24 = sshll.u32 %s517_s12, 3  ;;  %v193_v0 = vld [vmem:[%s169_s27] sm:$0xff] }
  0x27   : > { %s209_s4 = scalar_lea.hbm %s691_s2, %s318_s24  ;;  %s191_s5 = scalar_lea.vmem [#allocation7], %s315_s23 }
  0x28   : > { %s211_s6 = sshll.u32 %s191_s5, 4  ;;  %s213_s7 = sshll.u32 %s209_s4, 4  ;;  %s212_s6 = int_to_ptr.vmem [resolvable:$true] %s211_s6  ;;  %s214_s7 = int_to_ptr.hbm [resolvable:$true] %s213_s7 }
  0x29   : > { %s198_s19 = scalar_lea.sflag [#allocation4], %s642_s22  ;;  %s453_s8 = sshra.s32 %s214_s7, 4  ;;  %s454_s8 = int_to_ptr.hbm [resolvable:$true] %s453_s8 }
  0x2a   : > { %s455_s15 = scalar_lea.hbm %s454_s8, 8  ;;  %s459_s21 = scalar_lea.hbm %s691_s2, 16 }
  0x2b   : > { %p456_p1 = scmp.ne.s32.totalorder %s454_s8, %s455_s15  ;;  %p460_p8 = scmp.lt.s32.totalorder %s454_s8, %s691_s2 }
  0x2c   : > { %v194_v1 = vstv %s192_s17  ;;  %p461_p11 = scmp.lt.s32.totalorder %s459_s21, %s455_s15 }
  0x2d   : > { %v195_v2 = vmul.f32 %v194_v1, %v193_v0  ;;  %p457_p2 = pnand %p456_p1, %p621_p9 }
  0x2e   : > { %p462_p12 = por %p461_p11, %p460_p8 }
  0x2f   : > { %196 = vst [vmem:[%s191_s5] sm:$0xff] %v195_v2  ;;  %p458_p4 = pneg %p457_p2 }
  0x31   : > { %p463_p13 = pnand %p462_p12, %p458_p4 }
  0x33   : > { %466 = shalt.err (!%p463_p13)
}
  0x34   : > { %327 = dma.vmem_to_hbm [thread:$0]  (%p621_p9), %s212_s6, 128, %s214_s7, %s198_s19  }
  0x35 PF: > { %s225_s22 = sand.u32 1, %s505_s9   ;;  %p698_p0 = scmp.ge.s32.totalorder %s525_s14, 2 }
  0x36   : > { %s226_s26 = scalar_lea.sflag [#allocation4], %s225_s22 }
  0x37   : > { %p338_p3 = pnand %p698_p0, %p592_p6 }
  0x39   : > { %p339_p5 = pneg %p338_p3 }
  0x3b   : > { %500 = dma.done.wait (%p339_p5), %s226_s26, 128  }
  0x3c   : > { %502 = vsyncadd (%p339_p5), %s226_s26, 4294967168  ;;  %s19_s14 = sadd.s32 1, %s525_s14   ;;  %s699_s9 = smov %s509_s10 }
  0x3d   : > { %p16_p7 = scmp.ge.s32.totalorder %s19_s14, 4   ;;  %s700_s10 = smov %s513_s11 }
  0x3e   : > { %s701_s11 = smov %s627_s3  ;;  %s702_s12 = smov %s521_s13 }
  0x3f   : > { %s703_s13 = smov %s705_s25  ;;  %18 = sbr.rel (!%p16_p7) target bundleno = 7 (0x7), region = 78 }
  0x44   :  { %232 = vsyncpa [#allocation3], 1 }
  0x45   :  { %234 = vsyncpa [#allocation3 + $0x1], 1 }
  0x46   :  { %235 = vsyncpa [#allocation4], 1 }
  0x47   :  { %237 = vsyncpa [#allocation4 + $0x1], 1 }
  0x48   :  { %238 = vsyncpa [#allocation5], 1 }
  0x49   :  { %240 = vsyncpa [#allocation5 + $0x1], 1 }

</bundles_post_ra>
